<compile_context>
chip_gen: v7x
topology: tpu7x:2x2x1
jax: 0.10.0
libtpu: 0.0.40
codegen_flags: <defaults>
</compile_context>

<pallas_src>
import math

import jax
import jax.numpy as jnp
from jax.experimental import pallas as pl
from jax.experimental.pallas import tpu as pltpu

FC1_SIZE = 400
FC2_SIZE = 300
FC1_PAD = 512   # 400 -> next multiple of 128
FC2_PAD = 384   # 300 -> next multiple of 128


def _round_up(x, m):
    return (x + m - 1) // m * m


def _default_act_dtype():
    """bf16 bias-add/relu on chips with a bf16 VPU (v6e/v7x); f32 on v5x."""
    try:
        kind = jax.devices()[0].device_kind.lower()
    except Exception:
        return jnp.bfloat16
    if "v5" in kind:          # v5e / v5 lite: no bf16 VALU -> keep f32 VPU path
        return jnp.float32
    return jnp.bfloat16


def critic_kernel(s_ref, a_ref, w1_ref, b1_ref,
                  w2s_ref, w2a_ref, b2_ref,
                  w3_ref, b3_ref, o_ref):
    act_dtype = b1_ref.dtype            # f32 on v5e, bf16 on v6e/v7x
    zero = jnp.zeros((), act_dtype)

    # fc1: bf16 MXU matmul, f32 accumulation; bias-add + relu in act_dtype.
    xs = jnp.dot(s_ref[...], w1_ref[...], preferred_element_type=jnp.float32)
    xs = jnp.maximum(xs.astype(act_dtype) + b1_ref[...], zero)   # (TB, 512)

    # fc2 on concat([xs, action]) == xs @ W2s + action @ W2a, then relu.
    h = jnp.dot(xs.astype(jnp.bfloat16), w2s_ref[...],
                preferred_element_type=jnp.float32)
    h = h + jnp.dot(a_ref[...], w2a_ref[...],
                    preferred_element_type=jnp.float32)
    h = jnp.maximum(h.astype(act_dtype) + b2_ref[...], zero)     # (TB, 384)

    # fc3 (output width 1): VPU multiply + XLU cross-lane reduce (f32 accum),
    # instead of a 1-column MXU matmul.  Result is written lane-dense.
    q = jnp.sum(h.astype(jnp.float32) * w3_ref[...], axis=-1)    # (TB,) f32
    o_ref[0, :] = q + b3_ref[0]


def critic_forward(state, action, params, *, batch_tile=2048, act_dtype=None):
    """state: (B, S) f32, action: (B, A) f32 -> (B, 1) f32."""
    w1, b1, w2, b2, w3, b3 = params      # logical (unpadded) module parameters
    B, S = state.shape
    A = action.shape[1]
    if act_dtype is None:
        act_dtype = _default_act_dtype()

    # ---- batch tiling: multiples of 16 (bf16 packs 16 rows per vreg) --------
    B16 = _round_up(B, 16)
    TB = min(batch_tile, B16)
    # Guarantee >= 2 grid steps when there is enough batch, so the "parallel"
    # batch axis can shard across v7x's two TensorCores (one extra cheap step
    # on single-TC v5e/v6e).
    if B16 >= 32:
        TB = min(TB, _round_up((B16 + 1) // 2, 16))
    Bp = _round_up(B, TB)
    G = Bp // TB
    if Bp != B:
        state = jnp.pad(state, ((0, Bp - B), (0, 0)))
        action = jnp.pad(action, ((0, Bp - B), (0, 0)))

    # ---- pad weights to lane-dense feature dims (padded lanes exactly 0) ----
    # Done in the wrapper so the padded-lane-zero invariant can never be
    # violated by a caller; with fixed params under jit this is hoisted/cheap.
    w1p = jnp.zeros((S, FC1_PAD), jnp.float32).at[:, :FC1_SIZE].set(w1)
    b1p = jnp.zeros((1, FC1_PAD), jnp.float32).at[0, :FC1_SIZE].set(b1)
    w2s = jnp.zeros((FC1_PAD, FC2_PAD), jnp.float32).at[:FC1_SIZE, :FC2_SIZE].set(
        w2[:FC1_SIZE])
    w2a = jnp.zeros((A, FC2_PAD), jnp.float32).at[:, :FC2_SIZE].set(w2[FC1_SIZE:])
    b2p = jnp.zeros((1, FC2_PAD), jnp.float32).at[0, :FC2_SIZE].set(b2)
    w3_row = jnp.zeros((1, FC2_PAD), jnp.float32).at[0, :FC2_SIZE].set(w3[:, 0])
    b3_1d = b3.reshape(-1)[:1].astype(jnp.float32)            # (1,) scalar SMEM

    # bf16 MXU operands; biases in the activation dtype.
    s_bf = state.astype(jnp.bfloat16)
    a_bf = action.astype(jnp.bfloat16)
    w1_bf = w1p.astype(jnp.bfloat16)
    w2s_bf = w2s.astype(jnp.bfloat16)
    w2a_bf = w2a.astype(jnp.bfloat16)
    b1_a = b1p.astype(act_dtype)
    b2_a = b2p.astype(act_dtype)

    def batch_spec(feat):
        return pl.BlockSpec((TB, feat), lambda i: (i, 0))

    def resident(shape):
        # Constant index map -> DMA'd once, stays VMEM-resident across grid.
        return pl.BlockSpec(shape, lambda i: (0, 0))

    act_bytes = jnp.dtype(act_dtype).itemsize
    flops = 2 * Bp * (S * FC1_PAD + FC1_PAD * FC2_PAD + A * FC2_PAD + FC2_PAD)
    bytes_accessed = (
        Bp * (S + A) * 2 + Bp * 4                               # bf16 acts in, f32 q out
        + (S * FC1_PAD + FC1_PAD * FC2_PAD + A * FC2_PAD) * 2   # bf16 weights
        + (FC1_PAD + FC2_PAD) * act_bytes                       # biases
        + (FC2_PAD + 1) * 4)                                    # w3 row + b3

    out = pl.pallas_call(
        critic_kernel,
        out_shape=jax.ShapeDtypeStruct((G, TB), jnp.float32),   # lane-dense rows
        grid=(G,),
        in_specs=[
            batch_spec(S),                    # state tile       (TB, S)      bf16
            batch_spec(A),                    # action tile      (TB, A)      bf16
            resident((S, FC1_PAD)),           # W1                             bf16
            resident((1, FC1_PAD)),           # b1                             act
            resident((FC1_PAD, FC2_PAD)),     # W2 (state rows)                bf16
            resident((A, FC2_PAD)),           # W2 (action rows)               bf16
            resident((1, FC2_PAD)),           # b2                             act
            resident((1, FC2_PAD)),           # W3 as a row vector             f32
            pl.BlockSpec(memory_space=pltpu.MemorySpace.SMEM),  # b3 scalar    f32
        ],
        out_specs=pl.BlockSpec((1, TB), lambda i: (i, 0)),
        compiler_params=pltpu.CompilerParams(
            dimension_semantics=("parallel",),
            vmem_limit_bytes=32 * 1024 * 1024),
        cost_estimate=pl.CostEstimate(
            flops=flops, transcendentals=0, bytes_accessed=bytes_accessed),
    )(s_bf, a_bf, w1_bf, b1_a, w2s_bf, w2a_bf, b2_a, w3_row, b3_1d)

    return out.reshape(Bp, 1)[:B]


def init_params(key, num_states, num_actions):
    """Deterministic init mirroring CriticNetwork.reset_parameters().

    PyTorch's `_init_hidden` uses weight.size()[0] == out_features as "fan_in"
    (as written in the reference module), so we reproduce that exactly.
    Biases keep the default nn.Linear init: U(-1/sqrt(in_features), +).
    Weights are stored as (in, out), i.e. y = x @ W + b.  Unpadded shapes.
    """
    ks = jax.random.split(key, 6)

    def u(k, shape, lim):
        return jax.random.uniform(k, shape, jnp.float32, -lim, lim)

    # fc1: Linear(num_states, 400)
    w1 = u(ks[0], (num_states, FC1_SIZE), 1.0 / math.sqrt(FC1_SIZE))
    b1 = u(ks[1], (FC1_SIZE,), 1.0 / math.sqrt(num_states))
    # fc2: Linear(400 + num_actions, 300)
    w2 = u(ks[2], (FC1_SIZE + num_actions, FC2_SIZE), 1.0 / math.sqrt(FC2_SIZE))
    b2 = u(ks[3], (FC2_SIZE,), 1.0 / math.sqrt(FC1_SIZE + num_actions))
    # fc3: Linear(300, 1)
    w3 = u(ks[4], (FC2_SIZE, 1), 0.003)
    b3 = u(ks[5], (1,), 1.0 / math.sqrt(FC2_SIZE))

    return (w1, b1, w2, b2, w3, b3)


def critic_reference_f32(state, action, params):
    """Full-precision reference (exact PyTorch module forward semantics)."""
    w1, b1, w2, b2, w3, b3 = params
    xs = jax.nn.relu(state @ w1 + b1)
    x = jnp.concatenate([xs, action], axis=1)
    h = jax.nn.relu(x @ w2 + b2)
    return h @ w3 + b3


def critic_reference_kernel_numerics(state, action, params, act_dtype):
    """Reference matching the kernel's bf16-matmul / act_dtype bias-relu numerics."""
    w1, b1, w2, b2, w3, b3 = params
    bf = jnp.bfloat16
    zero = jnp.zeros((), act_dtype)
    xs = jnp.dot(state.astype(bf), w1.astype(bf),
                 preferred_element_type=jnp.float32)
    xs = jnp.maximum(xs.astype(act_dtype) + b1.astype(act_dtype), zero)
    w2s, w2a = w2[:FC1_SIZE], w2[FC1_SIZE:]
    h = jnp.dot(xs.astype(bf), w2s.astype(bf),
                preferred_element_type=jnp.float32)
    h = h + jnp.dot(action.astype(bf), w2a.astype(bf),
                    preferred_element_type=jnp.float32)
    h = jnp.maximum(h.astype(act_dtype) + b2.astype(act_dtype), zero)
    return jnp.sum(h.astype(jnp.float32) * w3[:, 0], axis=-1,
                   keepdims=True) + b3[0]


if __name__ == "__main__":
    num_states = 32
    num_actions = 8

    key = jax.random.PRNGKey(0)
    kp, ks, ka = jax.random.split(key, 3)
    params = init_params(kp, num_states, num_actions)
    act_dtype = _default_act_dtype()

    # Exercise both the single-step grid (tiny batch) and the multi-step,
    # padded, lane-dense-output path.
    for batch in (8, 100):
        state = jax.random.normal(ks, (batch, num_states), jnp.float32)
        action = jax.random.normal(ka, (batch, num_actions), jnp.float32)

        q = critic_forward(state, action, params)
        q = jax.block_until_ready(q)
        assert q.shape == (batch, 1), q.shape

        # Tight check against a reference with the kernel's exact mixed-precision
        # numerics (bf16 MXU operands, act_dtype bias/relu, f32 accumulation).
        q_kref = critic_reference_kernel_numerics(state, action, params, act_dtype)
        assert jnp.allclose(q, q_kref, atol=1e-3, rtol=1e-3), (q, q_kref)

        # Loose check against full-f32 module semantics (bf16 operand rounding).
        q_f32 = critic_reference_f32(state, action, params)
        assert jnp.allclose(q, q_f32, atol=3e-2, rtol=3e-2), (q, q_f32)

    print("KERNEL_OK")
</pallas_src>

<mosaic_0001>
module attributes {stable_mosaic.version = 11 : i64} {
  func.func @critic_kernel(%arg0: i32, %arg1: memref<16x32xbf16, #tpu.memory_space<vmem>>, %arg2: memref<16x8xbf16, #tpu.memory_space<vmem>>, %arg3: memref<32x512xbf16, #tpu.memory_space<vmem>>, %arg4: memref<1x512xbf16, #tpu.memory_space<vmem>>, %arg5: memref<512x384xbf16, #tpu.memory_space<vmem>>, %arg6: memref<8x384xbf16, #tpu.memory_space<vmem>>, %arg7: memref<1x384xbf16, #tpu.memory_space<vmem>>, %arg8: memref<1x384xf32, #tpu.memory_space<vmem>>, %arg9: memref<1xf32, #tpu.memory_space<smem>>, %arg10: memref<1x16xf32, #tpu.memory_space<vmem>>) attributes {dimension_semantics = [#tpu.dimension_semantics<parallel>], iteration_bounds = array<i64: 1>, scalar_prefetch = 0 : i64, scratch_operands = 0 : i64, tpu.core_type = #tpu.core_type<tc>, window_params = [{transform_indices = @transform_0, window_bounds = array<i64: 16, 32>}, {transform_indices = @transform_1, window_bounds = array<i64: 16, 8>}, {pipeline_mode = #tpu.pipeline_mode<synchronous>, transform_indices = @transform_2, window_bounds = array<i64: 32, 512>}, {pipeline_mode = #tpu.pipeline_mode<synchronous>, transform_indices = @transform_3, window_bounds = array<i64: 1, 512>}, {pipeline_mode = #tpu.pipeline_mode<synchronous>, transform_indices = @transform_4, window_bounds = array<i64: 512, 384>}, {pipeline_mode = #tpu.pipeline_mode<synchronous>, transform_indices = @transform_5, window_bounds = array<i64: 8, 384>}, {pipeline_mode = #tpu.pipeline_mode<synchronous>, transform_indices = @transform_6, window_bounds = array<i64: 1, 384>}, {pipeline_mode = #tpu.pipeline_mode<synchronous>, transform_indices = @transform_7, window_bounds = array<i64: 1, 384>}, {transform_indices = @transform_8, window_bounds = array<i64: 1>}, {transform_indices = @transform_9, window_bounds = array<i64: 1, 16>}]} {
    %c0 = arith.constant 0 : index
    %c0_0 = arith.constant 0 : index
    %0 = vector.load %arg1[%c0, %c0_0] : memref<16x32xbf16, #tpu.memory_space<vmem>>, vector<16x32xbf16>
    %c0_1 = arith.constant 0 : index
    %c0_2 = arith.constant 0 : index
    %1 = vector.load %arg3[%c0_1, %c0_2] : memref<32x512xbf16, #tpu.memory_space<vmem>>, vector<32x512xbf16>
    %cst = arith.constant dense<0.000000e+00> : vector<16x512xf32>
    %2 = tpu.matmul %0, %1, %cst {dimension_numbers = #tpu.dot_dimension_numbers<[1], [0], [0], [1], [0, 0, 1, 1], [], []>} : vector<16x32xbf16>, vector<32x512xbf16>, vector<16x512xf32> -> vector<16x512xf32>
    %3 = arith.truncf %2 : vector<16x512xf32> to vector<16x512xbf16>
    %c0_3 = arith.constant 0 : index
    %c0_4 = arith.constant 0 : index
    %4 = vector.load %arg4[%c0_3, %c0_4] : memref<1x512xbf16, #tpu.memory_space<vmem>>, vector<1x512xbf16>
    %5 = vector.broadcast %4 : vector<1x512xbf16> to vector<16x512xbf16>
    %6 = arith.addf %3, %5 : vector<16x512xbf16>
    %cst_5 = arith.constant 0.000000e+00 : bf16
    %7 = vector.broadcast %cst_5 : bf16 to vector<16x512xbf16>
    %8 = arith.maximumf %6, %7 : vector<16x512xbf16>
    %c0_6 = arith.constant 0 : index
    %c0_7 = arith.constant 0 : index
    %9 = vector.load %arg5[%c0_6, %c0_7] : memref<512x384xbf16, #tpu.memory_space<vmem>>, vector<512x384xbf16>
    %cst_8 = arith.constant dense<0.000000e+00> : vector<16x384xf32>
    %10 = tpu.matmul %8, %9, %cst_8 {dimension_numbers = #tpu.dot_dimension_numbers<[1], [0], [0], [1], [0, 0, 1, 1], [], []>} : vector<16x512xbf16>, vector<512x384xbf16>, vector<16x384xf32> -> vector<16x384xf32>
    %c0_9 = arith.constant 0 : index
    %c0_10 = arith.constant 0 : index
    %11 = vector.load %arg2[%c0_9, %c0_10] : memref<16x8xbf16, #tpu.memory_space<vmem>>, vector<16x8xbf16>
    %c0_11 = arith.constant 0 : index
    %c0_12 = arith.constant 0 : index
    %12 = vector.load %arg6[%c0_11, %c0_12] : memref<8x384xbf16, #tpu.memory_space<vmem>>, vector<8x384xbf16>
    %cst_13 = arith.constant dense<0.000000e+00> : vector<16x384xf32>
    %13 = tpu.matmul %11, %12, %cst_13 {dimension_numbers = #tpu.dot_dimension_numbers<[1], [0], [0], [1], [0, 0, 1, 1], [], []>} : vector<16x8xbf16>, vector<8x384xbf16>, vector<16x384xf32> -> vector<16x384xf32>
    %14 = arith.addf %10, %13 : vector<16x384xf32>
    %15 = arith.truncf %14 : vector<16x384xf32> to vector<16x384xbf16>
    %c0_14 = arith.constant 0 : index
    %c0_15 = arith.constant 0 : index
    %16 = vector.load %arg7[%c0_14, %c0_15] : memref<1x384xbf16, #tpu.memory_space<vmem>>, vector<1x384xbf16>
    %17 = vector.broadcast %16 : vector<1x384xbf16> to vector<16x384xbf16>
    %18 = arith.addf %15, %17 : vector<16x384xbf16>
    %cst_16 = arith.constant 0.000000e+00 : bf16
    %19 = vector.broadcast %cst_16 : bf16 to vector<16x384xbf16>
    %20 = arith.maximumf %18, %19 : vector<16x384xbf16>
    %21 = arith.extf %20 : vector<16x384xbf16> to vector<16x384xf32>
    %c0_17 = arith.constant 0 : index
    %c0_18 = arith.constant 0 : index
    %22 = vector.load %arg8[%c0_17, %c0_18] : memref<1x384xf32, #tpu.memory_space<vmem>>, vector<1x384xf32>
    %23 = vector.broadcast %22 : vector<1x384xf32> to vector<16x384xf32>
    %24 = arith.mulf %21, %23 : vector<16x384xf32>
    %cst_19 = arith.constant dense<0.000000e+00> : vector<16xf32>
    %25 = vector.multi_reduction <add>, %24, %cst_19 [1] : vector<16x384xf32> to vector<16xf32>
    %c0_20 = arith.constant 0 : index
    %26 = memref.load %arg9[%c0_20] : memref<1xf32, #tpu.memory_space<smem>>
    %27 = vector.broadcast %26 : f32 to vector<16xf32>
    %28 = arith.addf %25, %27 : vector<16xf32>
    %c0_21 = arith.constant 0 : index
    %c0_22 = arith.constant 0 : index
    %29 = vector.load %arg10[%c0_21, %c0_22] : memref<1x16xf32, #tpu.memory_space<vmem>>, vector<1x16xf32>
    %30 = vector.shape_cast %29 : vector<1x16xf32> to vector<16xf32>
    %31 = vector.shape_cast %28 : vector<16xf32> to vector<1x16xf32>
    tpu.vector_store %arg10[%c0_21, %c0_22], %31 {strides = array<i32>} : memref<1x16xf32, #tpu.memory_space<vmem>>, vector<1x16xf32>,
    return
  }
  func.func @transform_0(%arg0: i32) -> (i32, i32) {
    %c0_i32 = arith.constant 0 : i32
    %c0_i32_0 = arith.constant 0 : i32
    return %arg0, %c0_i32 : i32, i32
  }
  func.func @transform_1(%arg0: i32) -> (i32, i32) {
    %c0_i32 = arith.constant 0 : i32
    %c0_i32_0 = arith.constant 0 : i32
    return %arg0, %c0_i32 : i32, i32
  }
  func.func @transform_2(%arg0: i32) -> (i32, i32) {
    %c0_i32 = arith.constant 0 : i32
    %c0_i32_0 = arith.constant 0 : i32
    %c0_i32_1 = arith.constant 0 : i32
    return %c0_i32, %c0_i32_0 : i32, i32
  }
  func.func @transform_3(%arg0: i32) -> (i32, i32) {
    %c0_i32 = arith.constant 0 : i32
    %c0_i32_0 = arith.constant 0 : i32
    %c0_i32_1 = arith.constant 0 : i32
    return %c0_i32, %c0_i32_0 : i32, i32
  }
  func.func @transform_4(%arg0: i32) -> (i32, i32) {
    %c0_i32 = arith.constant 0 : i32
    %c0_i32_0 = arith.constant 0 : i32
    %c0_i32_1 = arith.constant 0 : i32
    return %c0_i32, %c0_i32_0 : i32, i32
  }
  func.func @transform_5(%arg0: i32) -> (i32, i32) {
    %c0_i32 = arith.constant 0 : i32
    %c0_i32_0 = arith.constant 0 : i32
    %c0_i32_1 = arith.constant 0 : i32
    return %c0_i32, %c0_i32_0 : i32, i32
  }
  func.func @transform_6(%arg0: i32) -> (i32, i32) {
    %c0_i32 = arith.constant 0 : i32
    %c0_i32_0 = arith.constant 0 : i32
    %c0_i32_1 = arith.constant 0 : i32
    return %c0_i32, %c0_i32_0 : i32, i32
  }
  func.func @transform_7(%arg0: i32) -> (i32, i32) {
    %c0_i32 = arith.constant 0 : i32
    %c0_i32_0 = arith.constant 0 : i32
    %c0_i32_1 = arith.constant 0 : i32
    return %c0_i32, %c0_i32_0 : i32, i32
  }
  func.func @transform_8(%arg0: i32) -> i32 {
    %c0_i32 = arith.constant 0 : i32
    %c0_i32_0 = arith.constant 0 : i32
    return %c0_i32 : i32
  }
  func.func @transform_9(%arg0: i32) -> (i32, i32) {
    %c0_i32 = arith.constant 0 : i32
    %c0_i32_0 = arith.constant 0 : i32
    return %arg0, %c0_i32 : i32, i32
  }
}

</mosaic_0001>

<bundles_post_ra>
// kernel: tpu_custom_call.1
= control target key start
LH: loop header
LB: loop body
LE: loop exit
PB: predicated region body
PF: predicated region fallthrough
CT: control target
= control target key end

     0   :  { %15 = vsyncpa [#allocation4], 0  ;;  %s1928_s0 = inlined_call_operand.vmem [shape: bf16[16,32], index: 0, kind: input, shape index: {}]   ;;  %s1929_s1 = inlined_call_operand.vmem [shape: bf16[16,8], index: 1, kind: input, shape index: {}]   ;;  %s1930_s2 = inlined_call_operand.hbm [shape: bf16[32,512], index: 2, kind: input, shape index: {}]   ;;  %s1931_s3 = inlined_call_operand.vmem [shape: bf16[1,512], index: 3, kind: input, shape index: {}]   ;;  %s1932_s4 = inlined_call_operand.hbm [shape: bf16[512,384], index: 4, kind: input, shape index: {}]   ;;  %s1933_s5 = inlined_call_operand.vmem [shape: bf16[8,384], index: 5, kind: input, shape index: {}]   ;;  %s1934_s6 = inlined_call_operand.vmem [shape: bf16[1,384], index: 6, kind: input, shape index: {}]   ;;  %s1935_s7 = inlined_call_operand.vmem [shape: f32[1,384], index: 7, kind: input, shape index: {}]   ;;  %s1936_s8 = inlined_call_operand.<no memory space> [shape: f32[1], index: 8, kind: input, shape index: {}]   ;;  %s1937_s9 = inlined_call_operand.hbm [shape: f32[1,16], index: 9, kind: output, shape index: {}]  }
   0x1   :  { %16 = vsyncpa [#allocation7], 0 }
   0x2   :  { %17 = vsyncpa [#allocation5], 0  ;;  %s1731_s30 = smov [#allocation3]   ;;  %s1659_s13 = scalar_lea.hbm %s1930_s2, 1024 }
   0x3   :  { %s27_s10 = sshll.u32 %s1731_s30, 4  ;;  %p1660_p0 = scmp.ne.s32.totalorder %s1930_s2, %s1659_s13  ;;  %s28_s10 = int_to_ptr.vmem [resolvable:$true] %s27_s10 }
   0x4   :  { %p1663_p1 = scmp.lt.u32.totalorder %s1659_s13, %s1930_s2 }
   0x6   :  { %p1665_p2 = pnand %p1663_p1, %p1660_p0 }
   0x8   :  { %1668 = shalt.err (!%p1665_p2)
}
   0x9   :  { %s1669_s18 = scalar_lea.vmem %s28_s10, 1024  ;;  %p1674_p4 = scmp.lt.s32.totalorder %s28_s10, %s28_s10 }
   0xa   :  { %p1670_p3 = scmp.ne.s32.totalorder %s28_s10, %s1669_s18  ;;  %p1675_p5 = scmp.lt.s32.totalorder %s1669_s18, %s1669_s18 }
   0xc   :  { %p1676_p6 = por %p1675_p5, %p1674_p4 }
   0xe   :  { %p1677_p7 = pnand %p1676_p6, %p1670_p3 }
  0x10   :  { %1680 = shalt.err (!%p1677_p7)
}
  0x11   :  { %s1732_s19 = smov 256   ;;  %s1733_s20 = smov 16  }
  0x12   :  { %33 = dma.hbm_to_vmem [thread:$0]  %s1930_s2, 1024, %s28_s10, [#allocation4], %s1732_s19, %s1732_s19, %s1733_s20  }
  0x13   :  { %s1734_s23 = smov [#allocation6]   ;;  %s1681_s27 = scalar_lea.hbm %s1932_s4, 12288 }
  0x14   :  { %s41_s24 = sshll.u32 %s1734_s23, 4  ;;  %p1682_p8 = scmp.ne.s32.totalorder %s1932_s4, %s1681_s27  ;;  %s42_s24 = int_to_ptr.vmem [resolvable:$true] %s41_s24 }
  0x15   :  { %p1685_p9 = scmp.lt.u32.totalorder %s1681_s27, %s1932_s4 }
  0x17   :  { %p1687_p10 = pnand %p1685_p9, %p1682_p8 }
  0x19   :  { %1690 = shalt.err (!%p1687_p10)
}
  0x1a   :  { %s1691_s12 = scalar_lea.vmem %s42_s24, 12288  ;;  %p1696_p12 = scmp.lt.s32.totalorder %s42_s24, %s42_s24 }
  0x1b   :  { %p1692_p11 = scmp.ne.s32.totalorder %s42_s24, %s1691_s12  ;;  %p1697_p13 = scmp.lt.s32.totalorder %s1691_s12, %s1691_s12 }
  0x1d   :  { %p1698_p0 = por %p1697_p13, %p1696_p12 }
  0x1f   :  { %p1699_p1 = pnand %p1698_p0, %p1692_p11 }
  0x21   :  { %1702 = shalt.err (!%p1699_p1)
}
  0x22   :  { %s1735_s2 = smov 192   ;;  %s1736_s10 = smov 12  }
  0x23   :  { %47 = dma.hbm_to_vmem [thread:$0]  %s1932_s4, 12288, %s42_s24, [#allocation7], %s1735_s2, %s1735_s2, %s1736_s10  }
  0x24   :  { %1725 = dma.done.wait [#allocation4], 1024  }
  0x25   :  { %1726 = vsyncadd [#allocation4], 4294966272 }
  0x26   :  { %1727 = dma.done.wait [#allocation7], 12288  }
  0x27   :  { %1728 = vsyncadd [#allocation7], 4294955008  ;;  %v1737_v0 = vmov 0   ;;  %v1514_v1 = vld [vmem:[#allocation3 + $0x4] ss:$16 sps:$4 sm:$0xff]   ;;  %vm118_vm0 = vcmask 261120  }
  0x28   :  { %154 = vmatprep.mubr.bf16.mxu1 %v1737_v0  ;;  %v1516_v2 = vld [vmem:[#allocation3] ss:$16 sps:$4 sm:$0xff]   ;;  %122 = vmatprep.subr.bf16.mxu1 %v1514_v1  ;;  %v1517_v3 = vld [vmem:[#allocation3 + $0x24] ss:$16 sps:$4 sm:$0xff]   ;;  %v1523_v5 = vld [vmem:[#allocation3 + $0xc] ss:$16 sps:$4 sm:$0xff]  }
  0x29   :  { %123 = vmatpush1.bf16.msra.mxu1 %v1516_v2  ;;  %v1519_v4 = vld [vmem:[#allocation3 + $0x20] ss:$16 sps:$4 sm:$0xff]   ;;  %v1521_v7 = vld [vmem:[#allocation3 + $0x8] ss:$16 sps:$4 sm:$0xff]   ;;  %v1526_v10 = vld [vmem:[#allocation3 + $0x2c] ss:$16 sps:$4 sm:$0xff]  }
  0x2a   :  { %124 = vmatprep.subr.bf16.mxu1 %v1517_v3  ;;  %v1520_v6 = vld [vmem:[%s1928_s0] sm:$0xff]   ;;  %v1530_v11 = vld [vmem:[#allocation6 + $0x1c] ss:$12 sps:$4 sm:$0xff]   ;;  %vm423_vm1 = vcmask 1043456   ;;  %v1536_v17 = vld [vmem:[#allocation6 + $0x4c] ss:$12 sps:$4 sm:$0xff]  }
  0x2b   :  { %v1527_v8 = vld [vmem:[#allocation6 + $0x4] ss:$12 sps:$4 sm:$0xff]   ;;  %v1529_v9 = vld [vmem:[#allocation6] ss:$12 sps:$4 sm:$0xff]   ;;  %v1524_v13 = vld [vmem:[#allocation3 + $0x28] ss:$16 sps:$4 sm:$0xff]  }
  0x2c   :  { %1029 = vmatprep.subr.bf16.mxu0 %v1527_v8  ;;  %v1532_v12 = vld [vmem:[#allocation6 + $0x18] ss:$12 sps:$4 sm:$0xff]   ;;  %v1533_v14 = vld [vmem:[#allocation6 + $0x34] ss:$12 sps:$4 sm:$0xff]   ;;  %v1535_v15 = vld [vmem:[#allocation6 + $0x30] ss:$12 sps:$4 sm:$0xff]  }
  0x2d   :  { %125 = vmatpush1.bf16.msra.mxu1 %v1519_v4  ;;  %1030 = vmatpush1.bf16.msra.mxu0 %v1529_v9  ;;  %v404_v16 = vld [vmem:[%s1933_s5] sm:$0xff]  ;;  %v1538_v21 = vld [vmem:[#allocation6 + $0x48] ss:$12 sps:$4 sm:$0xff]   ;;  %v1738_v24 = vmov 0.0   ;;  %vm419_vm2 = vcmask 64512   ;;  %vm1739_vm3 = vmmov 0  }
  0x2e   :  { %165 = vmatprep.subr.bf16.mxu1 %v1523_v5  ;;  %1031 = vmatprep.subr.bf16.mxu0 %v1530_v11  ;;  %v1341_v18 = vcombine.high %v404_v16, %v404_v16  ;;  %v1340_v19 = vcombine.low %v404_v16, %v404_v16  ;;  %v1539_v22 = vld [vmem:[#allocation6 + $0x64] ss:$12 sps:$4 sm:$0xff]   ;;  %v1553_v23 = vld [vmem:[%s1933_s5 + $0x8] ss:$0 sps:$4 sm:$0xff]   ;;  %v1541_v25 = vld [vmem:[#allocation6 + $0x60] ss:$12 sps:$4 sm:$0xff]  }
  0x2f   :  { %v1549_v26 = vld [vmem:[%s1929_s1] sm:$0xff]   ;;  %v1542_v27 = vld [vmem:[#allocation6 + $0x7c] ss:$12 sps:$4 sm:$0xff]   ;;  %v431_v28 = vsel %vm423_vm1, %v1553_v23, 0  ;;  %v1551_v33 = vld [vmem:[#allocation6 + $0xac] ss:$12 sps:$4 sm:$0xff]  }
  0x30   :  { %1336 = vmatmul.mubr.msk.bf16.vlgmr.msra.gmra.mrb[0].mxu1 %vm118_vm0, %v1520_v6  ;;  %v425_v20 = vsel %vm423_vm1, %v1340_v19, 0  ;;  %v1557_v29 = vld [vmem:[#allocation6 + $0xc8] ss:$12 sps:$4 sm:$0xff]   ;;  %v1545_v30 = vld [vmem:[#allocation6 + $0x78] ss:$12 sps:$4 sm:$0xff]   ;;  %s1741_s24 = smov [#allocation8]  }
  0x31   :  { %166 = vmatpush1.bf16.msra.mxu1 %v1521_v7  ;;  %197 = vmatprep.mubr.bf16.mxu1 %v1737_v0  ;;  %v1547_v31 = vld [vmem:[#allocation6 + $0x94] ss:$12 sps:$4 sm:$0xff]   ;;  %v1550_v32 = vld [vmem:[#allocation6 + $0x90] ss:$12 sps:$4 sm:$0xff]   ;;  %v1567_v40 = vld [vmem:[#allocation6 + $0xf8] ss:$12 sps:$4 sm:$0xff]   ;;  %v225_v7 = vlaneseq }
  0x32   :  { %167 = vmatprep.subr.bf16.mxu1 %v1526_v10  ;;  %1032 = vmatpush1.bf16.msra.mxu0 %v1532_v12  ;;  %v1559_v34 = vld [vmem:[#allocation6 + $0x8] ss:$12 sps:$4 sm:$0xff]   ;;  %v1562_v35 = vld [vmem:[#allocation6 + $0xe0] ss:$12 sps:$4 sm:$0xff]   ;;  %v1555_v37 = vld [vmem:[#allocation6 + $0xc4] ss:$12 sps:$4 sm:$0xff]  }
  0x33   :  { %1033 = vmatprep.subr.bf16.mxu0 %v1533_v14  ;;  %v1554_v36 = vld [vmem:[#allocation6 + $0xa8] ss:$12 sps:$4 sm:$0xff]   ;;  %v1564_v38 = vld [vmem:[#allocation6 + $0x20] ss:$12 sps:$4 sm:$0xff]   ;;  %v1569_v42 = vld [vmem:[#allocation6 + $0x38] ss:$12 sps:$4 sm:$0xff]  }
  0x34   :  { %v1558_v39 = vld [vmem:[#allocation6 + $0xc0] ss:$12 sps:$4 sm:$0xff]   ;;  %v1560_v41 = vld [vmem:[#allocation6 + $0xdc] ss:$12 sps:$4 sm:$0xff]   ;;  %v1563_v44 = vld [vmem:[#allocation6 + $0xd8] ss:$12 sps:$4 sm:$0xff]  }
  0x35   :  { %168 = vmatpush1.bf16.msra.mxu1 %v1524_v13  ;;  %v1572_v43 = vld [vmem:[#allocation6 + $0x110] ss:$12 sps:$4 sm:$0xff]   ;;  %v1565_v45 = vld [vmem:[#allocation6 + $0xf4] ss:$12 sps:$4 sm:$0xff]   ;;  %v1570_v49 = vld [vmem:[#allocation6 + $0x10c] ss:$12 sps:$4 sm:$0xff]  }
  0x36   :  { %1343 = vmatprep.subr.msk.bf16.mxu1 %vm423_vm1, %v1341_v18  ;;  %1034 = vmatpush1.bf16.msra.mxu0 %v1535_v15  ;;  %v1574_v46 = vld [vmem:[#allocation6 + $0x50] ss:$12 sps:$4 sm:$0xff]   ;;  %v1577_v47 = vld [vmem:[#allocation6 + $0x128] ss:$12 sps:$4 sm:$0xff]   ;;  %v1582_v51 = vld [vmem:[#allocation6 + $0x140] ss:$12 sps:$4 sm:$0xff]  }
  0x37   :  { %1035 = vmatprep.subr.bf16.mxu0 %v1536_v17  ;;  %v1568_v48 = vld [vmem:[#allocation6 + $0xf0] ss:$12 sps:$4 sm:$0xff]   ;;  %v1579_v50 = vld [vmem:[#allocation6 + $0x68] ss:$12 sps:$4 sm:$0xff]   ;;  %v1584_v54 = vld [vmem:[#allocation6 + $0x80] ss:$12 sps:$4 sm:$0xff]  }
  0x38   :  { %1337 = vmatmul.mubr.msk.bf16.vlgmr.msra.gmra.mrb[4].mxu1 %vm118_vm0, %v1520_v6  ;;  %v1573_v52 = vld [vmem:[#allocation6 + $0x108] ss:$12 sps:$4 sm:$0xff]   ;;  %v1575_v53 = vld [vmem:[#allocation6 + $0x124] ss:$12 sps:$4 sm:$0xff]   ;;  %v1578_v55 = vld [vmem:[#allocation6 + $0x120] ss:$12 sps:$4 sm:$0xff]  }
  0x39   :  { %434 = vmatpush1.bf16.msra.mxu1 %v425_v20  ;;  %465 = vmatprep.mubr.bf16.mxu1 %v1737_v0  ;;  %v1580_v56 = vld [vmem:[#allocation6 + $0x13c] ss:$12 sps:$4 sm:$0xff]   ;;  %v1583_v57 = vld [vmem:[#allocation6 + $0x138] ss:$12 sps:$4 sm:$0xff]   ;;  %v1585_v58 = vld [vmem:[#allocation6 + $0x154] ss:$12 sps:$4 sm:$0xff]  }
  0x3a   :  { %1489 = vmatprep.subr.bf16.mxu1 %v1738_v24  ;;  %1036 = vmatpush1.bf16.msra.mxu0 %v1538_v21  ;;  %v1587_v59 = vld [vmem:[#allocation6 + $0x158] ss:$12 sps:$4 sm:$0xff]   ;;  %v1588_v60 = vld [vmem:[#allocation6 + $0x150] ss:$12 sps:$4 sm:$0xff]   ;;  %v1593_v1 = vld [vmem:[#allocation6 + $0x168] ss:$12 sps:$4 sm:$0xff]  }
  0x3b   :  { %1037 = vmatprep.subr.bf16.mxu0 %v1539_v22  ;;  %v1589_v61 = vld [vmem:[#allocation6 + $0x98] ss:$12 sps:$4 sm:$0xff]   ;;  %v1592_v63 = vld [vmem:[#allocation6 + $0x170] ss:$12 sps:$4 sm:$0xff]   ;;  %v1598_v4 = vld [vmem:[#allocation6 + $0x248] ss:$12 sps:$4 sm:$0xff]  }
  0x3c   :  { %v1590_v62 = vld [vmem:[#allocation6 + $0x16c] ss:$12 sps:$4 sm:$0xff]   ;;  %v1594_v2 = vld [vmem:[#allocation6 + $0xb0] ss:$12 sps:$4 sm:$0xff]   ;;  %v1740_v5 = vmov 1966171168  }
  0x3d   :  { %v1597_v3 = vld [vmem:[#allocation6 + $0x184] ss:$12 sps:$4 sm:$0xff]   ;;  %v223_v6 = vunpack.c.l.s4 %v1740_v5  ;;  %v1839_v9 = vshrl.u32 %v225_v7, 7  ;;  %s1317_s25 = sshll.u32 %s1741_s24, 4  ;;  %vm1306_vm4 = vcmask 130112   ;;  %vm1309_vm5 = vcmask 122880   ;;  %s1318_s25 = int_to_ptr.vmem [resolvable:$true] %s1317_s25 }
  0x3e   :  { %1038 = vmatpush1.bf16.msra.mxu0 %v1541_v25  ;;  %v1338_v10 = vld.sshfl [vmem:[%s1931_s3] sm:$0x33 pattern:$0x75316420]  ;;  %s1703_s26 = scalar_lea.vmem %s1318_s25, 16  ;;  %p1708_p3 = scmp.lt.s32.totalorder %s1318_s25, %s1318_s25 }
  0x3f   :  { %1039 = vmatprep.subr.bf16.mxu0 %v1542_v27  ;;  %v224_v8 = vunpack.c.0.s8 %v223_v6  ;;  %v221_v12 = vcombine.high %v1338_v10, %v1338_v10  ;;  %v1854_v16 = vsub.s32 0, %v1839_v9  ;;  %p1704_p2 = scmp.ne.s32.totalorder %s1318_s25, %s1703_s26 }
  0x40   :  { %1344 = vmatmul.mubr.msk.bf16.vlgmr.msra.gmra.mrb[8].mxu1 %vm419_vm2, %v1549_v26 }
  0x41   :  { %1490 = vmatpush3.bf16.msra.mxu1 %v431_v28  ;;  %1491 = vmatprep.mubr.msk.bf16.mxu1 %vm1739_vm3, %v1738_v24  ;;  %v1845_v11 = vsub.s32 %v224_v8, %v1839_v9 }
  0x42   :  { %1445 = vmatprep.subr.bf16.mxu1 %v1557_v29  ;;  %1040 = vmatpush1.bf16.msra.mxu0 %v1545_v30 }
  0x43   :  { %1041 = vmatprep.subr.bf16.mxu0 %v1547_v31  ;;  %v1848_v13 = vrot.slane %v1338_v10, %v1845_v11  ;;  %v235_v14 = vrot.slane %v221_v12, %v1845_v11  ;;  %v1595_v31 = vld [vmem:[#allocation6 + $0x180] ss:$12 sps:$4 sm:$0xff]   ;;  %v1620_v10 = vld [vmem:[#allocation6 + $0x1f8] ss:$12 sps:$4 sm:$0xff]  }
  0x44   :  { %v1624_v12 = vld [vmem:[#allocation6 + $0x200] ss:$12 sps:$4 sm:$0xff]  }
  0x45   :  { %v239_v15 = vpack.i.b16 %v1848_v13, %v1848_v13  ;;  %v246_v17 = vpack.i.b16 %v235_v14, %v235_v14  ;;  %v237_v23 = vcombine.high %v235_v14, %v235_v14  ;;  %v1628_v14 = vld [vmem:[#allocation6 + $0x2d8] ss:$12 sps:$4 sm:$0xff]  }
  0x46   :  { %1042 = vmatpush1.bf16.msra.mxu0 %v1550_v32  ;;  %v1599_v32 = vld [vmem:[#allocation6 + $0x188] ss:$12 sps:$4 sm:$0xff]  }
  0x47   :  { %1043 = vmatprep.subr.bf16.mxu0 %v1551_v33  ;;  %v244_v20 = vrot.slane %v239_v15, %v1854_v16  ;;  %v251_v22 = vrot.slane %v246_v17, %v1854_v16  ;;  %v260_v29 = vpack.i.b16 %v237_v23, %v237_v23  ;;  %v1625_v17 = vld [vmem:[#allocation6 + $0x210] ss:$12 sps:$4 sm:$0xff]  }
  0x48   :  { %1492 = vmatmul.mubr.msk.bf16.vlgmr.msra.gmra.mrb[12].mxu1 %vm419_vm2, %v1549_v26  ;;  %v1634_v23 = vld [vmem:[#allocation6 + $0x230] ss:$12 sps:$4 sm:$0xff]  }
  0x49   :  { %1446 = vmatpush3.bf16.msra.mxu1 %v1559_v34 }
  0x4a   :  { %1447 = vmatprep.subr.bf16.mxu1 %v1562_v35  ;;  %1044 = vmatpush1.bf16.msra.mxu0 %v1554_v36  ;;  %v1602_v35 = vld [vmem:[#allocation6 + $0x19c] ss:$12 sps:$4 sm:$0xff]   ;;  %v1603_v36 = vld [vmem:[#allocation6 + $0x260] ss:$12 sps:$4 sm:$0xff]  }
  0x4b   :  { %1045 = vmatprep.subr.bf16.mxu0 %v1555_v37 }
  0x4d   :  { %1448 = vmatpush3.bf16.msra.mxu1 %v1564_v38 }
  0x4e   :  { %1449 = vmatprep.subr.bf16.mxu1 %v1567_v40  ;;  %1046 = vmatpush1.bf16.msra.mxu0 %v1558_v39  ;;  %v265_v39 = vrot.slane %v260_v29, %v1854_v16  ;;  %v1643_v29 = vld [vmem:[#allocation6 + $0x274] ss:$12 sps:$4 sm:$0xff]  }
  0x4f   :  { %1047 = vmatprep.subr.bf16.mxu0 %v1560_v41 }
  0x51   :  { %1450 = vmatpush3.bf16.msra.mxu1 %v1569_v42  ;;  %v1600_v42 = vld [vmem:[#allocation6 + $0x198] ss:$12 sps:$4 sm:$0xff]  }
  0x52   :  { %1451 = vmatprep.subr.bf16.mxu1 %v1572_v43  ;;  %1048 = vmatpush1.bf16.msra.mxu0 %v1563_v44  ;;  %v1604_v43 = vld [vmem:[#allocation6 + $0x1a0] ss:$12 sps:$4 sm:$0xff]  }
  0x53   :  { %1049 = vmatprep.subr.bf16.mxu0 %v1565_v45  ;;  %v1607_v45 = vld [vmem:[#allocation6 + $0x1b4] ss:$12 sps:$4 sm:$0xff]  }
  0x55   :  { %1452 = vmatpush3.bf16.msra.mxu1 %v1574_v46  ;;  %v1608_v46 = vld [vmem:[#allocation6 + $0x278] ss:$12 sps:$4 sm:$0xff]  }
  0x56   :  { %1453 = vmatprep.subr.bf16.mxu1 %v1577_v47  ;;  %1050 = vmatpush1.bf16.msra.mxu0 %v1568_v48  ;;  %v1605_v48 = vld [vmem:[#allocation6 + $0x1b0] ss:$12 sps:$4 sm:$0xff]  }
  0x57   :  { %1051 = vmatprep.subr.bf16.mxu0 %v1570_v49  ;;  %v1609_v49 = vld [vmem:[#allocation6 + $0x1b8] ss:$12 sps:$4 sm:$0xff]  }
  0x59   :  { %1454 = vmatpush3.bf16.msra.mxu1 %v1579_v50 }
  0x5a   :  { %1455 = vmatprep.subr.bf16.mxu1 %v1582_v51  ;;  %1052 = vmatpush1.bf16.msra.mxu0 %v1573_v52  ;;  %v1612_v52 = vld [vmem:[#allocation6 + $0x1cc] ss:$12 sps:$4 sm:$0xff]  }
  0x5b   :  { %1053 = vmatprep.subr.bf16.mxu0 %v1575_v53  ;;  %v1613_v53 = vld [vmem:[#allocation6 + $0x290] ss:$12 sps:$4 sm:$0xff]  }
  0x5d   :  { %1456 = vmatpush3.bf16.msra.mxu1 %v1584_v54 }
  0x5e   :  { %1054 = vmatpush1.bf16.msra.mxu0 %v1578_v55  ;;  %1457 = vmatprep.subr.bf16.mxu1 %v1587_v59  ;;  %v1617_v59 = vld [vmem:[#allocation6 + $0x1e4] ss:$12 sps:$4 sm:$0xff]  }
  0x5f   :  { %1055 = vmatprep.subr.bf16.mxu0 %v1580_v56 }
  0x61   :  { %1458 = vmatpush3.bf16.msra.mxu1 %v1589_v61  ;;  %v236_v61 = vcombine.high %v1848_v13, %v1848_v13  ;;  %v1627_v13 = vld [vmem:[#allocation6 + $0x214] ss:$12 sps:$4 sm:$0xff]  }
  0x62   :  { %1056 = vmatpush1.bf16.msra.mxu0 %v1583_v57  ;;  %1459 = vmatprep.subr.bf16.mxu1 %v1592_v63  ;;  %v1610_v57 = vld [vmem:[#allocation6 + $0x1c8] ss:$12 sps:$4 sm:$0xff]  }
  0x63   :  { %1057 = vmatprep.subr.bf16.mxu0 %v1585_v58  ;;  %v1614_v58 = vld [vmem:[#allocation6 + $0x1d0] ss:$12 sps:$4 sm:$0xff]   ;;  %v1619_v63 = vld [vmem:[#allocation6 + $0x1e8] ss:$12 sps:$4 sm:$0xff]   ;;  %v253_v6 = vpack.i.b16 %v236_v61, %v236_v61 }
  0x65   :  { %1460 = vmatpush3.bf16.msra.mxu1 %v1594_v2  ;;  %v1622_v2 = vld [vmem:[#allocation6 + $0x1fc] ss:$12 sps:$4 sm:$0xff]   ;;  %v258_v15 = vrot.slane %v253_v6, %v1854_v16 }
  0x66   :  { %1058 = vmatpush1.bf16.msra.mxu0 %v1588_v60  ;;  %1467 = vmatprep.subr.bf16.mxu1 %v1598_v4  ;;  %v1618_v60 = vld [vmem:[#allocation6 + $0x2a8] ss:$12 sps:$4 sm:$0xff]  }
  0x67   :  { %1059 = vmatprep.subr.bf16.mxu0 %v1590_v62  ;;  %v1615_v62 = vld [vmem:[#allocation6 + $0x1e0] ss:$12 sps:$4 sm:$0xff]  }
  0x6a   :  { %1060 = vmatpush1.bf16.msra.mxu0 %v1593_v1 }
  0x6b   :  { %1072 = vmatprep.subr.bf16.mxu0 %v1597_v3  ;;  %v1623_v3 = vld [vmem:[#allocation6 + $0x2c0] ss:$12 sps:$4 sm:$0xff]  }
 0x103   :  { %v156_v18 = vpop.f32.mrb[0].mxu1 }
 0x104   :  { %v158_v19 = vpop.f32.mrb[1].mxu1 }
 0x105   :  { %v160_v21 = vpop.f32.mrb[2].mxu1 }
 0x106   :  { %v208_v24 = vpack.c.bf16 %v160_v21, %v156_v18  ;;  %v162_v25 = vpop.f32.mrb[3].mxu1  ;;  %v1629_v18 = vld [vmem:[#allocation6 + $0x218] ss:$12 sps:$4 sm:$0xff]  }
 0x107   :  { %v209_v26 = vpack.c.bf16 %v162_v25, %v158_v19  ;;  %v1632_v19 = vld [vmem:[#allocation6 + $0x22c] ss:$12 sps:$4 sm:$0xff]  }
 0x108   :  { %v266_v27 = vadd.bf16 %v244_v20, %v208_v24  ;;  %v1633_v20 = vld [vmem:[#allocation6 + $0x2f0] ss:$12 sps:$4 sm:$0xff]  }
 0x109   :  { %v267_v28 = vadd.bf16 %v251_v22, %v209_v26  ;;  %v1630_v22 = vld [vmem:[#allocation6 + $0x228] ss:$12 sps:$4 sm:$0xff]   ;;  %v1637_v24 = vld [vmem:[#allocation6 + $0x244] ss:$12 sps:$4 sm:$0xff]   ;;  %v1635_v26 = vld [vmem:[#allocation6 + $0x240] ss:$12 sps:$4 sm:$0xff]  }
 0x10a   :  { %v270_v34 = vmax.bf16 %v1737_v0, %v266_v27  ;;  %v1640_v27 = vld [vmem:[#allocation6 + $0x25c] ss:$12 sps:$4 sm:$0xff]  }
 0x10b   :  { %v271_v30 = vmax.bf16 %v1737_v0, %v267_v28  ;;  %v1859_v33 = vpop.f32.mrb[4].mxu1  ;;  %v1638_v28 = vld [vmem:[#allocation6 + $0x258] ss:$12 sps:$4 sm:$0xff]  }
 0x10c   :  { %v201_v37 = vpop.f32.mrb[5].mxu1 }
 0x10d   :  { %1061 = vmatprep.mubr.bf16.mxu0 %v271_v30  ;;  %1147 = vmatprep.mubr.bf16.mxu1 %v271_v30  ;;  %v1862_v38 = vpop.f32.mrb[6].mxu1  ;;  %v1641_v30 = vld [vmem:[#allocation6 + $0x270] ss:$12 sps:$4 sm:$0xff]  }
 0x10e   :  { %1062 = vmatmul.mubr.bf16.vlgmr.msra.gmra.mrb[0].mxu0 %v270_v34  ;;  %1148 = vmatmul.mubr.bf16.vlgmr.msra.gmra.mrb[16].mxu1 %v270_v34  ;;  %v210_v40 = vpack.c.bf16 %v1862_v38, %v1859_v33  ;;  %v205_v41 = vpop.f32.mrb[7].mxu1  ;;  %v1649_v33 = vld [vmem:[#allocation6 + $0x2a4] ss:$12 sps:$4 sm:$0xff]   ;;  %v1647_v34 = vld [vmem:[#allocation6 + $0x2a0] ss:$12 sps:$4 sm:$0xff]  }
 0x10f   :  { %1073 = vmatpush1.bf16.msra.mxu0 %v1595_v31  ;;  %1468 = vmatpush3.bf16.msra.mxu1 %v1599_v32  ;;  %v211_v44 = vpack.c.bf16 %v205_v41, %v201_v37  ;;  %v1646_v31 = vld [vmem:[#allocation6 + $0x28c] ss:$12 sps:$4 sm:$0xff]   ;;  %v1644_v32 = vld [vmem:[#allocation6 + $0x288] ss:$12 sps:$4 sm:$0xff]   ;;  %v1653_v38 = vld [vmem:[#allocation6 + $0x2d0] ss:$12 sps:$4 sm:$0xff]  }
 0x110   :  { %1074 = vmatprep.subr.bf16.mxu0 %v1602_v35  ;;  %1469 = vmatprep.subr.bf16.mxu1 %v1603_v36  ;;  %v268_v21 = vadd.bf16 %v258_v15, %v210_v40  ;;  %v1652_v35 = vld [vmem:[#allocation6 + $0x2bc] ss:$12 sps:$4 sm:$0xff]   ;;  %v1650_v36 = vld [vmem:[#allocation6 + $0x2b8] ss:$12 sps:$4 sm:$0xff]   ;;  %v1655_v37 = vld [vmem:[#allocation6 + $0x2d4] ss:$12 sps:$4 sm:$0xff]  }
 0x111   :  { %v269_v47 = vadd.bf16 %v265_v39, %v211_v44  ;;  %v1658_v39 = vld [vmem:[#allocation6 + $0x2ec] ss:$12 sps:$4 sm:$0xff]   ;;  %v1656_v40 = vld [vmem:[#allocation6 + $0x2e8] ss:$12 sps:$4 sm:$0xff]  }
 0x112   :  { %v272_v25 = vmax.bf16 %v1737_v0, %v268_v21 }
 0x113   :  { %1075 = vmatpush1.bf16.msra.mxu0 %v1600_v42  ;;  %1470 = vmatpush3.bf16.msra.mxu1 %v1604_v43  ;;  %v273_v50 = vmax.bf16 %v1737_v0, %v269_v47  ;;  %v1868_v51 = vpop.f32.mrb[8].mxu1 }
 0x114   :  { %1076 = vmatprep.subr.bf16.mxu0 %v1607_v45  ;;  %1471 = vmatprep.subr.bf16.mxu1 %v1608_v46  ;;  %v1870_v54 = vpop.f32.mrb[9].mxu1 }
 0x115   :  { %1188 = vmatprep.mubr.bf16.mxu1 %v273_v50  ;;  %1104 = vmatprep.mubr.bf16.mxu0 %v273_v50  ;;  %v1872_v55 = vpop.f32.mrb[10].mxu1 }
 0x116   :  { %v1874_v56 = vpop.f32.mrb[11].mxu1 }
 0x117   :  { %1077 = vmatpush1.bf16.msra.mxu0 %v1605_v48  ;;  %1472 = vmatpush3.bf16.msra.mxu1 %v1609_v49 }
 0x118   :  { %1078 = vmatprep.subr.bf16.mxu0 %v1612_v52  ;;  %1473 = vmatprep.subr.bf16.mxu1 %v1613_v53 }
 0x11b   :  { %1079 = vmatpush1.bf16.msra.mxu0 %v1610_v57  ;;  %1474 = vmatpush3.bf16.msra.mxu1 %v1614_v58  ;;  %v1878_v1 = vpop.f32.mrb[12].mxu1 }
 0x11c   :  { %1080 = vmatprep.subr.bf16.mxu0 %v1617_v59  ;;  %1475 = vmatprep.subr.bf16.mxu1 %v1618_v60  ;;  %v1493_v4 = vpop.f32.mrb[13].mxu1 }
 0x11d   :  { %v1880_v5 = vpop.f32.mrb[14].mxu1 }
 0x11e   :  { %v1494_v8 = vpop.f32.mrb[15].mxu1 }
 0x11f   :  { %1081 = vmatpush1.bf16.msra.mxu0 %v1615_v62  ;;  %1476 = vmatpush3.bf16.msra.mxu1 %v1619_v63  ;;  %v1442_v62 = vld.sshfl [vmem:[%s1934_s6] sm:$0x13 pattern:$0x75316420] }
 0x120   :  { %1082 = vmatprep.subr.bf16.mxu0 %v1622_v2  ;;  %1477 = vmatprep.subr.bf16.mxu1 %v1623_v3  ;;  %v1216_v63 = vrot.slane %v1442_v62, %v1845_v11 }
 0x122   :  { %v1224_v2 = vcombine.high %v1216_v63, %v1216_v63 }
 0x123   :  { %1083 = vmatpush1.bf16.msra.mxu0 %v1620_v10  ;;  %1478 = vmatpush3.bf16.msra.mxu1 %v1624_v12 }
 0x124   :  { %1084 = vmatprep.subr.bf16.mxu0 %v1627_v13  ;;  %1479 = vmatprep.subr.bf16.mxu1 %v1628_v14  ;;  %v1240_v3 = vpack.i.b16 %v1224_v2, %v1224_v2 }
 0x126   :  { %v1245_v6 = vrot.slane %v1240_v3, %v1854_v16 }
 0x127   :  { %1085 = vmatpush1.bf16.msra.mxu0 %v1625_v17  ;;  %1480 = vmatpush3.bf16.msra.mxu1 %v1629_v18 }
 0x128   :  { %1086 = vmatprep.subr.bf16.mxu0 %v1632_v19  ;;  %1481 = vmatprep.subr.bf16.mxu1 %v1633_v20 }
 0x12b   :  { %1087 = vmatpush1.bf16.msra.mxu0 %v1630_v22  ;;  %1482 = vmatpush3.bf16.msra.mxu1 %v1634_v23 }
 0x12c   :  { %1088 = vmatprep.subr.bf16.mxu0 %v1637_v24  ;;  %v1266_v24 = vsub.s32 1, %v1839_v9 }
 0x12e   :  { %1189 = vmatmul.mubr.bf16.vlgmr.msra.gmra.mrb[20].mxu1 %v272_v25 }
 0x12f   :  { %1089 = vmatpush1.bf16.msra.mxu0 %v1635_v26 }
 0x130   :  { %1090 = vmatprep.subr.bf16.mxu0 %v1640_v27 }
 0x133   :  { %1091 = vmatpush1.bf16.msra.mxu0 %v1638_v28 }
 0x134   :  { %1092 = vmatprep.subr.bf16.mxu0 %v1643_v29 }
 0x137   :  { %1093 = vmatpush1.bf16.msra.mxu0 %v1641_v30 }
 0x138   :  { %1094 = vmatprep.subr.bf16.mxu0 %v1646_v31 }
 0x13b   :  { %1095 = vmatpush1.bf16.msra.mxu0 %v1644_v32 }
 0x13c   :  { %1096 = vmatprep.subr.bf16.mxu0 %v1649_v33 }
 0x13f   :  { %1097 = vmatpush1.bf16.msra.mxu0 %v1647_v34 }
 0x140   :  { %1098 = vmatprep.subr.bf16.mxu0 %v1652_v35 }
 0x143   :  { %1099 = vmatpush1.bf16.msra.mxu0 %v1650_v36 }
 0x144   :  { %1100 = vmatprep.subr.bf16.mxu0 %v1655_v37 }
 0x147   :  { %1101 = vmatpush1.bf16.msra.mxu0 %v1653_v38 }
 0x148   :  { %1102 = vmatprep.subr.bf16.mxu0 %v1658_v39 }
 0x14b   :  { %1103 = vmatpush1.bf16.msra.mxu0 %v1656_v40 }
 0x14e   :  { %1105 = vmatmul.mubr.bf16.vlgmr.msra.gmra.mrb[0].mxu0 %v272_v25 }
 0x1e1   :  { %v1461_v41 = vpop.f32.mrb[16].mxu1 }
 0x1e2   :  { %v1462_v42 = vpop.f32.mrb[17].mxu1 }
 0x1e3   :  { %v1463_v43 = vadd.f32 %v1462_v42, %v1461_v41  ;;  %v1464_v44 = vpop.f32.mrb[18].mxu1 }
 0x1e4   :  { %v1465_v45 = vpop.f32.mrb[19].mxu1 }
 0x1e5   :  { %v1150_v46 = vadd.f32 %v1463_v43, %v1878_v1  ;;  %v1466_v47 = vadd.f32 %v1465_v45, %v1464_v44  ;;  %v1209_v1 = vcombine.high %v1442_v62, %v1442_v62 }
 0x1e7   :  { %v1153_v48 = vadd.f32 %v1466_v47, %v1880_v5  ;;  %v1223_v4 = vrot.slane %v1209_v1, %v1845_v11  ;;  %v1226_v5 = vpack.i.b16 %v1216_v63, %v1216_v63  ;;  %v1290_v47 = vstv %s1936_s8  ;;  %s1707_s8 = scalar_lea.vmem %s1318_s25, 32 }
 0x1e8   :  { %p1709_p4 = scmp.lt.s32.totalorder %s1707_s8, %s1703_s26 }
 0x1e9   :  { %v1233_v10 = vpack.i.b16 %v1223_v4, %v1223_v4  ;;  %v1231_v18 = vrot.slane %v1226_v5, %v1854_v16 }
 0x1ea   :  { %p1710_p5 = por %p1709_p4, %p1708_p3 }
 0x1eb   :  { %v1238_v11 = vrot.slane %v1233_v10, %v1854_v16 }
 0x1ec   :  { %p1711_p6 = pnand %p1710_p5, %p1704_p2 }
 0x201   :  { %v1483_v49 = vpop.f32.mrb[20].mxu1 }
 0x202   :  { %v1484_v50 = vpop.f32.mrb[21].mxu1 }
 0x203   :  { %v1485_v52 = vadd.f32 %v1484_v50, %v1483_v49  ;;  %v1486_v53 = vpop.f32.mrb[22].mxu1 }
 0x204   :  { %v1487_v57 = vpop.f32.mrb[23].mxu1 }
 0x205   :  { %v1191_v58 = vadd.f32 %v1485_v52, %v1150_v46  ;;  %v1488_v59 = vadd.f32 %v1487_v57, %v1486_v53 }
 0x207   :  { %v1194_v60 = vadd.f32 %v1488_v59, %v1153_v48 }
 0x209   :  { %v1199_v61 = vpack.c.bf16 %v1194_v60, %v1191_v58 }
 0x20b   :  { %v1248_v20 = vadd.bf16 %v1245_v6, %v1199_v61 }
 0x221   :  { %v1106_v8 = vpop.f32.mrb[0].mxu0 }
 0x222   :  { %v1495_v12 = vadd.f32 %v1106_v8, %v1868_v51  ;;  %v1108_v13 = vpop.f32.mrb[1].mxu0  ;;  %v1270_v51 = vsub.s32 2, %v1839_v9 }
 0x223   :  { %v1496_v14 = vadd.f32 %v1108_v13, %v1870_v54  ;;  %v1110_v15 = vpop.f32.mrb[2].mxu0  ;;  %v1251_v54 = vmax.bf16 %v1737_v0, %v1248_v20 }
 0x224   :  { %v1497_v17 = vadd.f32 %v1110_v15, %v1872_v55  ;;  %v1112_v19 = vpop.f32.mrb[3].mxu0  ;;  %v1258_v55 = vld [vmem:[%s1935_s7] sm:$0x7] }
 0x225   :  { %v1498_v21 = vadd.f32 %v1112_v19, %v1874_v56  ;;  %v1263_v56 = vrot.slane %v1258_v55, %v1854_v16  ;;  %v1267_v29 = vrot.slane %v1258_v55, %v1266_v24  ;;  %v1271_v31 = vrot.slane %v1258_v55, %v1270_v51 }
 0x226   :  { %v1197_v22 = vpack.c.bf16 %v1497_v17, %v1495_v12  ;;  %v1254_v34 = vunpack.c.l.bf16 %v1251_v54  ;;  %v1257_v36 = vunpack.c.h.bf16 %v1251_v54 }
 0x227   :  { %v1198_v23 = vpack.c.bf16 %v1498_v21, %v1496_v14 }
 0x228   :  { %v1246_v25 = vadd.bf16 %v1231_v18, %v1197_v22  ;;  %v1277_v41 = vmul.f32 %v1271_v31, %v1254_v34  ;;  %v1280_v43 = vmul.f32 %v1271_v31, %v1257_v36 }
 0x229   :  { %v1247_v26 = vadd.bf16 %v1238_v11, %v1198_v23 }
 0x22a   :  { %v1249_v27 = vmax.bf16 %v1737_v0, %v1246_v25 }
 0x22b   :  { %v1250_v28 = vmax.bf16 %v1737_v0, %v1247_v26  ;;  %v1296_v0 = vand.u32 127, %v225_v7 }
 0x22c   :  { %v1252_v30 = vunpack.c.l.bf16 %v1249_v27  ;;  %v1255_v32 = vunpack.c.h.bf16 %v1249_v27 }
 0x22d   :  { %v1253_v33 = vunpack.c.l.bf16 %v1250_v28  ;;  %v1256_v35 = vunpack.c.h.bf16 %v1250_v28  ;;  %v1301_v46 = vadd.s32 4294967288, %v1296_v0  ;;  %v1299_v49 = vsub.s32 %v1296_v0, %v1839_v9 }
 0x22e   :  { %v1275_v37 = vmul.f32 %v1263_v56, %v1252_v30  ;;  %v1278_v38 = vmul.f32 %v1263_v56, %v1255_v32 }
 0x22f   :  { %v1276_v39 = vmul.f32 %v1267_v29, %v1253_v33  ;;  %v1279_v40 = vmul.f32 %v1267_v29, %v1256_v35  ;;  %v1304_v52 = vsub.s32 %v1301_v46, %v1839_v9 }
 0x231   :  { %v1281_v42 = vadd.f32 %v1276_v39, %v1275_v37  ;;  %v1285_v44 = vadd.f32 %v1279_v40, %v1278_v38 }
 0x233   :  { %v1282_v45 = vadd.f32 %v1281_v42, %v1277_v41  ;;  %v1286_v16 = vadd.f32 %v1285_v44, %v1280_v43 }
 0x235   :  { %1283 = vadd.xlane.f32.xlu0 %v1282_v45 }
 0x239   :  { %1287 = vadd.xlane.f32.xlu0 %v1286_v16 }
 0x2c2   :  { %v1284_v48 = vpop.xlane.xlu0 %1283 }
 0x2c3   :  { %v1291_v50 = vadd.f32 %v1290_v47, %v1284_v48 }
 0x2c5   :  { %v1300_v58 = vrot.slane %v1291_v50, %v1299_v49 }
 0x2c6   :  { %v1288_v53 = vpop.xlane.xlu0 %1287 }
 0x2c7   :  { %v1292_v57 = vadd.f32 %v1290_v47, %v1288_v53 }
 0x2c9   :  { %v1305_v59 = vrot.slane %v1292_v57, %v1304_v52 }
 0x2cb   :  { %v1307_v7 = vsel %vm1306_vm4, %v1305_v59, %v1300_v58 }
 0x2cc   :  { %1310 = vst.msk [vmem:[#allocation8] sm:$0x1] %vm1309_vm5, %v1307_v7 }
 0x2cd   :  { %1714 = shalt.err (!%p1711_p6)
}
 0x2ce   :  { %s1715_s29 = scalar_lea.hbm %s1937_s9, 16 }
 0x2cf   :  { %p1716_p7 = scmp.ne.s32.totalorder %s1937_s9, %s1715_s29  ;;  %p1719_p8 = scmp.lt.u32.totalorder %s1715_s29, %s1937_s9 }
 0x2d1   :  { %p1721_p9 = pnand %p1719_p8, %p1716_p7 }
 0x2d3   :  { %1724 = shalt.err (!%p1721_p9)
}
 0x2d4   :  { %1320 = dma.vmem_to_hbm [thread:$0]  %s1318_s25, 16, %s1937_s9, [#allocation5]  }
 0x2d5   :  { %1729 = dma.done.wait [#allocation5], 16  }
 0x2d6   :  { %1730 = vsyncadd [#allocation5], 4294967280 }
 0x2d7   :  { %1324 = vsyncpa [#allocation4], 1 }
 0x2d8   :  { %1325 = vsyncpa [#allocation7], 1 }
 0x2d9   :  { %1326 = vsyncpa [#allocation5], 1 }

</bundles_post_ra>
